<compile_context>
chip_gen: v6e
topology: v6e:2x2x1
jax: 0.10.0
libtpu: 0.0.40
codegen_flags: <defaults>
</compile_context>

<pallas_src>
import math

import jax
import jax.numpy as jnp
from jax.experimental import pallas as pl
from jax.experimental.pallas import tpu as pltpu

H1, H2 = 512, 128  # lin1 / lin2 output widths (lin3 output width is 1)


def mlp_kernel(x_ref, w1_ref, w2_ref, row_ref, b3_ref, o_ref):
    # Packed small-operand row: [ b1 (512) | b2 (128) | w3 (128) ], all f32.
    # Slice boundaries (0/512/640/768) are multiples of 128 -> clean lane slices.
    b1 = row_ref[:, 0:H1]
    b2 = row_ref[:, H1:H1 + H2]
    w3 = row_ref[:, H1 + H2:H1 + 2 * H2]

    # lin1 + relu : bf16 operands on the MXU, f32 accumulate, f32 epilogue.
    # x arrives f32; cast here (cheap VPU pack) instead of a wrapper-side op.
    x_bf = x_ref[...].astype(jnp.bfloat16)
    h1 = jnp.dot(x_bf, w1_ref[...], preferred_element_type=jnp.float32)
    h1 = jnp.maximum(h1 + b1, 0.0)

    # lin2 + relu
    h2 = jnp.dot(h1.astype(jnp.bfloat16), w2_ref[...],
                 preferred_element_type=jnp.float32)
    h2 = jnp.maximum(h2 + b2, 0.0)

    # lin3 (out_features == 1): VPU multiply + lane reduce instead of a
    # 1-column MXU matmul. b3 is a scalar read from SMEM.
    o_ref[...] = jnp.sum(h2 * w3, axis=-1, keepdims=True) + b3_ref[0, 0]


def prepare_params(params):
    """One-time packing of torch-Linear-equivalent f32 params into the kernel
    layout. Call this OUTSIDE the per-forward path (the whole point is to not
    re-cast the weights to bf16 on every call)."""
    w1, b1, w2, b2, w3, b3 = params
    w1_bf = w1.astype(jnp.bfloat16)                       # (D, 512)
    w2_bf = w2.astype(jnp.bfloat16)                       # (512, 128)
    row = jnp.concatenate(
        [b1.reshape(1, -1), b2.reshape(1, -1), w3.reshape(1, -1)],
        axis=1).astype(jnp.float32)                       # (1, 768)
    b3s = b3.reshape(1, 1).astype(jnp.float32)            # (1, 1) -> SMEM
    return w1_bf, w2_bf, row, b3s


@jax.jit
def simple_mlp_forward(x, packed):
    """x: (B, C, H, W) float32. packed = prepare_params(params).
    Returns (B,) float32."""
    w1_bf, w2_bf, row, b3s = packed
    B = x.shape[0]
    D = math.prod(x.shape[1:])          # static python ints; no host sync
    x_flat = x.reshape(B, D)            # row-major flatten == torch .view

    # Everything fits comfortably in VMEM at these sizes: single grid point,
    # full-array blocks (block_shape == array shape satisfies tiling rules).
    # TODO(synk): if B grows beyond toy scale, add a grid over B:
    #   - batch axis marked dimension_semantics=("parallel",) so v7x's two
    #     TensorCores split it; tm a multiple of 256 (512-1024 on v6e),
    #   - weight index_maps returning (0, 0) so w1/w2 stay VMEM-resident,
    #   - lane-dense (1, tm) output blocks instead of a (tm, 1) column,
    #   - tile budget derived from v7x's 64 MiB/TC VMEM, not 128 MiB.
    out = pl.pallas_call(
        mlp_kernel,
        out_shape=jax.ShapeDtypeStruct((B, 1), jnp.float32),
        in_specs=[
            pl.BlockSpec(x_flat.shape, lambda: (0, 0)),
            pl.BlockSpec(w1_bf.shape, lambda: (0, 0)),
            pl.BlockSpec(w2_bf.shape, lambda: (0, 0)),
            pl.BlockSpec(row.shape, lambda: (0, 0)),
            pl.BlockSpec(memory_space=pltpu.MemorySpace.SMEM),
        ],
        out_specs=pl.BlockSpec((B, 1), lambda: (0, 0)),
        compiler_params=pltpu.CompilerParams(vmem_limit_bytes=16 << 20),
    )(x_flat, w1_bf, w2_bf, row, b3s)

    return out.reshape(-1)  # == torch .view(-1)


def init_params(key, in_features):
    """Deterministic init mimicking torch.nn.Linear default
    U(-1/sqrt(in), 1/sqrt(in)). Weights stored as (in, out), f32."""
    dims = [(in_features, H1), (H1, H2), (H2, 1)]
    params = []
    for (fin, fout) in dims:
        key, kw, kb = jax.random.split(key, 3)
        bound = 1.0 / (fin ** 0.5)
        w = jax.random.uniform(kw, (fin, fout), jnp.float32, -bound, bound)
        b = jax.random.uniform(kb, (fout,), jnp.float32, -bound, bound)
        params += [w, b]
    return tuple(params)


if __name__ == "__main__":
    # input_shape = (B, C, H, W) = (2, 4, 16, 16) -> flat features = 4*16*16 = 1024
    B, C, H, W = 2, 4, 16, 16
    key = jax.random.PRNGKey(0)
    key, kx = jax.random.split(key)
    x = jax.random.normal(kx, (B, C, H, W), jnp.float32)

    params = init_params(key, C * H * W)
    packed = prepare_params(params)     # one-time bf16 / layout packing

    y = simple_mlp_forward(x, packed)
    jax.block_until_ready(y)

    # Reference 1: mirrors the kernel's precision (bf16 operands, f32 acc).
    w1, b1, w2, b2, w3, b3 = params
    xf = x.reshape(B, -1)
    r = jnp.dot(xf.astype(jnp.bfloat16), w1.astype(jnp.bfloat16),
                preferred_element_type=jnp.float32)
    r = jnp.maximum(r + b1, 0.0)
    r = jnp.dot(r.astype(jnp.bfloat16), w2.astype(jnp.bfloat16),
                preferred_element_type=jnp.float32)
    r = jnp.maximum(r + b2, 0.0)
    r_bf16 = (r @ w3 + b3).reshape(-1)

    # Reference 2: pure f32 (PyTorch-equivalent math), loose tolerance since
    # the kernel deliberately runs the big matmuls in bf16.
    rf = jnp.maximum(xf @ w1 + b1, 0.0)
    rf = jnp.maximum(rf @ w2 + b2, 0.0)
    r_f32 = (rf @ w3 + b3).reshape(-1)

    assert y.shape == (B,)
    assert jnp.allclose(y, r_bf16, atol=1e-2, rtol=1e-2)
    assert jnp.allclose(y, r_f32, atol=5e-2, rtol=5e-2)

    print("KERNEL_OK")
</pallas_src>

<mosaic_0001>
module attributes {stable_mosaic.version = 11 : i64} {
  func.func @mlp_kernel(%arg0: memref<2x1024xf32, #tpu.memory_space<vmem>>, %arg1: memref<1024x512xbf16, #tpu.memory_space<vmem>>, %arg2: memref<512x128xbf16, #tpu.memory_space<vmem>>, %arg3: memref<1x768xf32, #tpu.memory_space<vmem>>, %arg4: memref<1x1xf32, #tpu.memory_space<smem>>, %arg5: memref<2x1xf32, #tpu.memory_space<vmem>>) attributes {dimension_semantics = [], scalar_prefetch = 0 : i64, scratch_operands = 0 : i64, tpu.core_type = #tpu.core_type<tc>} {
    %c0 = arith.constant 0 : index
    %c0_0 = arith.constant 0 : index
    %0 = vector.load %arg3[%c0, %c0_0] : memref<1x768xf32, #tpu.memory_space<vmem>>, vector<1x512xf32>
    %c0_1 = arith.constant 0 : index
    %c512 = arith.constant 512 : index
    %1 = vector.load %arg3[%c0_1, %c512] : memref<1x768xf32, #tpu.memory_space<vmem>>, vector<1x128xf32>
    %c0_2 = arith.constant 0 : index
    %c640 = arith.constant 640 : index
    %2 = vector.load %arg3[%c0_2, %c640] : memref<1x768xf32, #tpu.memory_space<vmem>>, vector<1x128xf32>
    %c0_3 = arith.constant 0 : index
    %c0_4 = arith.constant 0 : index
    %3 = vector.load %arg0[%c0_3, %c0_4] : memref<2x1024xf32, #tpu.memory_space<vmem>>, vector<2x1024xf32>
    %4 = arith.truncf %3 : vector<2x1024xf32> to vector<2x1024xbf16>
    %c0_5 = arith.constant 0 : index
    %c0_6 = arith.constant 0 : index
    %5 = vector.load %arg1[%c0_5, %c0_6] : memref<1024x512xbf16, #tpu.memory_space<vmem>>, vector<1024x512xbf16>
    %cst = arith.constant dense<0.000000e+00> : vector<2x512xf32>
    %6 = tpu.matmul %4, %5, %cst {dimension_numbers = #tpu.dot_dimension_numbers<[1], [0], [0], [1], [0, 0, 1, 1], [], []>} : vector<2x1024xbf16>, vector<1024x512xbf16>, vector<2x512xf32> -> vector<2x512xf32>
    %7 = vector.broadcast %0 : vector<1x512xf32> to vector<2x512xf32>
    %8 = arith.addf %6, %7 : vector<2x512xf32>
    %cst_7 = arith.constant 0.000000e+00 : f32
    %9 = vector.broadcast %cst_7 : f32 to vector<2x512xf32>
    %10 = arith.maximumf %8, %9 : vector<2x512xf32>
    %11 = arith.truncf %10 : vector<2x512xf32> to vector<2x512xbf16>
    %c0_8 = arith.constant 0 : index
    %c0_9 = arith.constant 0 : index
    %12 = vector.load %arg2[%c0_8, %c0_9] : memref<512x128xbf16, #tpu.memory_space<vmem>>, vector<512x128xbf16>
    %cst_10 = arith.constant dense<0.000000e+00> : vector<2x128xf32>
    %13 = tpu.matmul %11, %12, %cst_10 {dimension_numbers = #tpu.dot_dimension_numbers<[1], [0], [0], [1], [0, 0, 1, 1], [], []>} : vector<2x512xbf16>, vector<512x128xbf16>, vector<2x128xf32> -> vector<2x128xf32>
    %14 = vector.broadcast %1 : vector<1x128xf32> to vector<2x128xf32>
    %15 = arith.addf %13, %14 : vector<2x128xf32>
    %cst_11 = arith.constant 0.000000e+00 : f32
    %16 = vector.broadcast %cst_11 : f32 to vector<2x128xf32>
    %17 = arith.maximumf %15, %16 : vector<2x128xf32>
    %18 = vector.broadcast %2 : vector<1x128xf32> to vector<2x128xf32>
    %19 = arith.mulf %17, %18 : vector<2x128xf32>
    %cst_12 = arith.constant dense<0.000000e+00> : vector<2xf32>
    %20 = vector.multi_reduction <add>, %19, %cst_12 [1] : vector<2x128xf32> to vector<2xf32>
    %21 = vector.shape_cast %20 : vector<2xf32> to vector<2x1xf32>
    %c0_13 = arith.constant 0 : index
    %c0_14 = arith.constant 0 : index
    %22 = memref.load %arg4[%c0_13, %c0_14] : memref<1x1xf32, #tpu.memory_space<smem>>
    %23 = vector.broadcast %22 : f32 to vector<2x1xf32>
    %24 = arith.addf %21, %23 : vector<2x1xf32>
    %c0_15 = arith.constant 0 : index
    %c0_16 = arith.constant 0 : index
    %25 = vector.load %arg5[%c0_15, %c0_16] : memref<2x1xf32, #tpu.memory_space<vmem>>, vector<2x1xf32>
    tpu.vector_store %arg5[%c0_15, %c0_16], %24 {strides = array<i32>} : memref<2x1xf32, #tpu.memory_space<vmem>>, vector<2x1xf32>,
    return
  }
}

</mosaic_0001>

<bundles_post_ra>
// kernel: simple_mlp_forward.1
= control target key start
LH: loop header
LB: loop body
LE: loop exit
PB: predicated region body
PF: predicated region fallthrough
CT: control target
= control target key end

     0   :  { %11 = vsyncpa [#allocation4], 0  ;;  %s3298_s0 = inlined_call_operand.vmem [shape: f32[2,1024], index: 0, kind: input, shape index: {}]   ;;  %s3299_s1 = inlined_call_operand.hbm [shape: bf16[1024,512], index: 1, kind: input, shape index: {}]   ;;  %s3300_s2 = inlined_call_operand.hbm [shape: bf16[512,128], index: 2, kind: input, shape index: {}]   ;;  %s3301_s3 = inlined_call_operand.vmem [shape: f32[1,768], index: 3, kind: input, shape index: {}]   ;;  %s3302_s4 = inlined_call_operand.<no memory space> [shape: f32[1,1], index: 4, kind: input, shape index: {}]   ;;  %s3303_s5 = inlined_call_operand.vmem [shape: f32[2,1], index: 5, kind: output, shape index: {}]  }
   0x1   :  { %12 = vsyncpa [#allocation6], 0  ;;  %s3168_s18 = smov [#allocation3]  }
   0x2   :  { %s20_s19 = sshll.u32 %s3168_s18, 4  ;;  %s21_s19 = int_to_ptr.vmem [resolvable:$true] %s20_s19 }
   0x3   :  { %s3132_s20 = scalar_lea.vmem %s21_s19, 32768  ;;  %p3137_p1 = scmp.lt.s32.totalorder %s21_s19, %s21_s19 }
   0x4   :  { %p3133_p0 = scmp.ne.s32.totalorder %s21_s19, %s3132_s20  ;;  %p3138_p2 = scmp.lt.s32.totalorder %s3132_s20, %s3132_s20 }
   0x6   :  { %p3139_p3 = por %p3138_p2, %p3137_p1 }
   0x8   :  { %p3140_p4 = pnand %p3139_p3, %p3133_p0 }
   0xa   :  { %3143 = shalt.err (!%p3140_p4)
}
   0xb   :  { %s3169_s21 = smov 256   ;;  %s3170_s22 = smov 16  }
   0xc   :  { %26 = dma.hbm_to_vmem [thread:$0]  %s3299_s1, 32768, %s21_s19, [#allocation4], %s3169_s21, %s3169_s21, %s3170_s22  }
   0xd   :  { %s3171_s25 = smov [#allocation5]  }
   0xe   :  { %s32_s26 = sshll.u32 %s3171_s25, 4  ;;  %s33_s26 = int_to_ptr.vmem [resolvable:$true] %s32_s26 }
   0xf   :  { %s3152_s27 = scalar_lea.vmem %s33_s26, 4096  ;;  %p3157_p6 = scmp.lt.s32.totalorder %s33_s26, %s33_s26 }
  0x10   :  { %p3153_p5 = scmp.ne.s32.totalorder %s33_s26, %s3152_s27  ;;  %p3158_p7 = scmp.lt.s32.totalorder %s3152_s27, %s3152_s27 }
  0x12   :  { %p3159_p8 = por %p3158_p7, %p3157_p6 }
  0x14   :  { %p3160_p9 = pnand %p3159_p8, %p3153_p5 }
  0x16   :  { %3163 = shalt.err (!%p3160_p9)
}
  0x17   :  { %s3172_s28 = smov 64   ;;  %s3173_s29 = smov 4  }
  0x18   :  { %38 = dma.hbm_to_vmem [thread:$0]  %s3300_s2, 4096, %s33_s26, [#allocation6], %s3172_s28, %s3172_s28, %s3173_s29  }
  0x19   :  { %3164 = dma.done.wait [#allocation4], 32768  }
  0x1a   :  { %3165 = vsyncadd [#allocation4], 4294934528 }
  0x1b   :  { %3166 = dma.done.wait [#allocation6], 4096  }
  0x1c   :  { %3167 = vsyncadd [#allocation6], 4294963200  ;;  %v2706_v0 = vld [vmem:[#allocation3 + $0xe4] ss:$16 sps:$4 sm:$0xff]   ;;  %v2710_v2 = vld [vmem:[#allocation3 + $0xe0] ss:$16 sps:$4 sm:$0xff]   ;;  %v61_v38 = vlaneseq }
  0x1d   :  { %v2708_v1 = vld [vmem:[#allocation3 + $0x2e4] ss:$16 sps:$4 sm:$0xff]   ;;  %1664 = vmatprep.subr.bf16.mxu0 %v2706_v0  ;;  %v2711_v3 = vld [vmem:[#allocation3 + $0x2e0] ss:$16 sps:$4 sm:$0xff]   ;;  %v3174_v36 = vmov 1983009808  }
  0x1e   :  { %1705 = vmatprep.subr.bf16.mxu1 %v2708_v1  ;;  %v2712_v4 = vld [vmem:[#allocation3 + $0xc4] ss:$16 sps:$4 sm:$0xff]   ;;  %1665 = vmatpush1.bf16.msra.mxu0 %v2710_v2  ;;  %v2716_v6 = vld [vmem:[#allocation3 + $0xc0] ss:$16 sps:$4 sm:$0xff]   ;;  %v59_v37 = vunpack.c.l.s4 %v3174_v36  ;;  %v3211_v43 = vshrl.u32 %v61_v38, 7  ;;  %vm2350_vm0 = vcmask 1041408  }
  0x1f   :  { %1706 = vmatpush1.bf16.msra.mxu1 %v2711_v3  ;;  %v2714_v5 = vld [vmem:[#allocation3 + $0x2c4] ss:$16 sps:$4 sm:$0xff]   ;;  %1666 = vmatprep.subr.bf16.mxu0 %v2712_v4  ;;  %v2717_v7 = vld [vmem:[#allocation3 + $0x2c0] ss:$16 sps:$4 sm:$0xff]   ;;  %vm2357_vm1 = vcmask 1024  }
  0x20   :  { %1707 = vmatprep.subr.bf16.mxu1 %v2714_v5  ;;  %v2718_v8 = vld [vmem:[#allocation3 + $0xa4] ss:$16 sps:$4 sm:$0xff]   ;;  %v2722_v10 = vld [vmem:[#allocation3 + $0xa0] ss:$16 sps:$4 sm:$0xff]   ;;  %v60_v42 = vunpack.c.0.s8 %v59_v37 }
  0x21   :  { %v2720_v9 = vld [vmem:[#allocation3 + $0x2a4] ss:$16 sps:$4 sm:$0xff]   ;;  %v2723_v11 = vld [vmem:[#allocation3 + $0x2a0] ss:$16 sps:$4 sm:$0xff]  }
  0x22   :  { %1667 = vmatpush1.bf16.msra.mxu0 %v2716_v6  ;;  %v2724_v12 = vld [vmem:[#allocation3 + $0x84] ss:$16 sps:$4 sm:$0xff]   ;;  %v2728_v14 = vld [vmem:[#allocation3 + $0x80] ss:$16 sps:$4 sm:$0xff]   ;;  %v3214_v49 = vsub.s32 %v60_v42, %v3211_v43  ;;  %v54_v42 = vld [vmem:[%s3298_s0 + $0x8] sm:$0xff] }
  0x23   :  { %1708 = vmatpush1.bf16.msra.mxu1 %v2717_v7  ;;  %1668 = vmatprep.subr.bf16.mxu0 %v2718_v8  ;;  %v2726_v13 = vld [vmem:[#allocation3 + $0x284] ss:$16 sps:$4 sm:$0xff]   ;;  %v2729_v15 = vld [vmem:[#allocation3 + $0x280] ss:$16 sps:$4 sm:$0xff]  }
  0x24   :  { %1709 = vmatprep.subr.bf16.mxu1 %v2720_v9  ;;  %v2730_v16 = vld [vmem:[#allocation3 + $0x64] ss:$16 sps:$4 sm:$0xff]   ;;  %v2734_v18 = vld [vmem:[#allocation3 + $0x60] ss:$16 sps:$4 sm:$0xff]  }
  0x25   :  { %v2732_v17 = vld [vmem:[#allocation3 + $0x264] ss:$16 sps:$4 sm:$0xff]   ;;  %v2735_v19 = vld [vmem:[#allocation3 + $0x260] ss:$16 sps:$4 sm:$0xff]  }
  0x26   :  { %1669 = vmatpush1.bf16.msra.mxu0 %v2722_v10  ;;  %v2736_v20 = vld [vmem:[#allocation3 + $0x44] ss:$16 sps:$4 sm:$0xff]   ;;  %v2740_v22 = vld [vmem:[#allocation3 + $0x40] ss:$16 sps:$4 sm:$0xff]  }
  0x27   :  { %1710 = vmatpush1.bf16.msra.mxu1 %v2723_v11  ;;  %1670 = vmatprep.subr.bf16.mxu0 %v2724_v12  ;;  %v2738_v21 = vld [vmem:[#allocation3 + $0x244] ss:$16 sps:$4 sm:$0xff]   ;;  %v2741_v23 = vld [vmem:[#allocation3 + $0x240] ss:$16 sps:$4 sm:$0xff]  }
  0x28   :  { %1711 = vmatprep.subr.bf16.mxu1 %v2726_v13  ;;  %v2742_v24 = vld [vmem:[#allocation3 + $0x24] ss:$16 sps:$4 sm:$0xff]   ;;  %v2746_v26 = vld [vmem:[#allocation3 + $0x20] ss:$16 sps:$4 sm:$0xff]  }
  0x29   :  { %v2744_v25 = vld [vmem:[#allocation3 + $0x224] ss:$16 sps:$4 sm:$0xff]   ;;  %v2747_v27 = vld [vmem:[#allocation3 + $0x220] ss:$16 sps:$4 sm:$0xff]  }
  0x2a   :  { %1671 = vmatpush1.bf16.msra.mxu0 %v2728_v14  ;;  %v2748_v28 = vld [vmem:[#allocation3 + $0x4] ss:$16 sps:$4 sm:$0xff]   ;;  %v2752_v30 = vld [vmem:[#allocation3] ss:$16 sps:$4 sm:$0xff]  }
  0x2b   :  { %1712 = vmatpush1.bf16.msra.mxu1 %v2729_v15  ;;  %1672 = vmatprep.subr.bf16.mxu0 %v2730_v16  ;;  %v2750_v29 = vld [vmem:[#allocation3 + $0x204] ss:$16 sps:$4 sm:$0xff]   ;;  %v2753_v31 = vld [vmem:[#allocation3 + $0x200] ss:$16 sps:$4 sm:$0xff]  }
  0x2c   :  { %1713 = vmatprep.subr.bf16.mxu1 %v2732_v17  ;;  %v2754_v32 = vld [vmem:[#allocation3 + $0x1e4] ss:$16 sps:$4 sm:$0xff]   ;;  %v2758_v34 = vld [vmem:[#allocation3 + $0x1e0] ss:$16 sps:$4 sm:$0xff]  }
  0x2d   :  { %v2756_v33 = vld [vmem:[#allocation3 + $0x3e4] ss:$16 sps:$4 sm:$0xff]   ;;  %v2759_v35 = vld [vmem:[#allocation3 + $0x3e0] ss:$16 sps:$4 sm:$0xff]  }
  0x2e   :  { %1673 = vmatpush1.bf16.msra.mxu0 %v2734_v18  ;;  %v2760_v39 = vld [vmem:[#allocation3 + $0x1c4] ss:$16 sps:$4 sm:$0xff]   ;;  %v2764_v41 = vld [vmem:[#allocation3 + $0x1c0] ss:$16 sps:$4 sm:$0xff]  }
  0x2f   :  { %1714 = vmatpush1.bf16.msra.mxu1 %v2735_v19  ;;  %1674 = vmatprep.subr.bf16.mxu0 %v2736_v20  ;;  %v2762_v40 = vld [vmem:[#allocation3 + $0x3c4] ss:$16 sps:$4 sm:$0xff]   ;;  %v2765_v44 = vld [vmem:[#allocation3 + $0x3c0] ss:$16 sps:$4 sm:$0xff]  }
  0x30   :  { %1715 = vmatprep.subr.bf16.mxu1 %v2738_v21  ;;  %v2766_v45 = vld [vmem:[#allocation3 + $0x1a4] ss:$16 sps:$4 sm:$0xff]   ;;  %v2770_v47 = vld [vmem:[#allocation3 + $0x1a0] ss:$16 sps:$4 sm:$0xff]  }
  0x31   :  { %v2768_v46 = vld [vmem:[#allocation3 + $0x3a4] ss:$16 sps:$4 sm:$0xff]   ;;  %v2771_v48 = vld [vmem:[#allocation3 + $0x3a0] ss:$16 sps:$4 sm:$0xff]  }
  0x32   :  { %1675 = vmatpush1.bf16.msra.mxu0 %v2740_v22  ;;  %v2772_v50 = vld [vmem:[#allocation3 + $0x184] ss:$16 sps:$4 sm:$0xff]   ;;  %v2776_v53 = vld [vmem:[#allocation3 + $0x180] ss:$16 sps:$4 sm:$0xff]  }
  0x33   :  { %1716 = vmatpush1.bf16.msra.mxu1 %v2741_v23  ;;  %1676 = vmatprep.subr.bf16.mxu0 %v2742_v24  ;;  %v2774_v51 = vld [vmem:[#allocation3 + $0x384] ss:$16 sps:$4 sm:$0xff]   ;;  %v2777_v56 = vld [vmem:[#allocation3 + $0x380] ss:$16 sps:$4 sm:$0xff]  }
  0x34   :  { %1717 = vmatprep.subr.bf16.mxu1 %v2744_v25  ;;  %v53_v52 = vld [vmem:[%s3298_s0] sm:$0xff] }
  0x35   :  { %v64_v54 = vrot.slane %v53_v52, %v3214_v49  ;;  %v57_v55 = vcombine.high %v53_v52, %v53_v52  ;;  %v2778_v57 = vld [vmem:[#allocation3 + $0x164] ss:$16 sps:$4 sm:$0xff]   ;;  %v2782_v61 = vld [vmem:[#allocation3 + $0x160] ss:$16 sps:$4 sm:$0xff]  }
  0x36   :  { %1677 = vmatpush1.bf16.msra.mxu0 %v2746_v26  ;;  %v2780_v58 = vld [vmem:[#allocation3 + $0x364] ss:$16 sps:$4 sm:$0xff]   ;;  %v2783_v0 = vld [vmem:[#allocation3 + $0x360] ss:$16 sps:$4 sm:$0xff]  }
  0x37   :  { %1718 = vmatpush1.bf16.msra.mxu1 %v2747_v27  ;;  %1678 = vmatprep.subr.bf16.mxu0 %v2748_v28  ;;  %v72_v59 = vcombine.high %v64_v54, %v64_v54  ;;  %v71_v60 = vrot.slane %v57_v55, %v3214_v49  ;;  %v2784_v1 = vld [vmem:[#allocation3 + $0x144] ss:$16 sps:$4 sm:$0xff]   ;;  %v2788_v4 = vld [vmem:[#allocation3 + $0x140] ss:$16 sps:$4 sm:$0xff]   ;;  %v3227_v16 = vpack.c.bf16 %v64_v54, %v64_v54 }
  0x38   :  { %1719 = vmatprep.subr.bf16.mxu1 %v2750_v29  ;;  %v2786_v2 = vld [vmem:[#allocation3 + $0x344] ss:$16 sps:$4 sm:$0xff]   ;;  %v2789_v5 = vld [vmem:[#allocation3 + $0x340] ss:$16 sps:$4 sm:$0xff]  }
  0x39   :  { %v3221_v62 = vpack.c.bf16 %v72_v59, %v72_v59  ;;  %v73_v63 = vcombine.high %v71_v60, %v71_v60  ;;  %v2790_v6 = vld [vmem:[#allocation3 + $0x124] ss:$16 sps:$4 sm:$0xff]   ;;  %v2794_v8 = vld [vmem:[#allocation3 + $0x120] ss:$16 sps:$4 sm:$0xff]   ;;  %v3229_v17 = vpack.c.bf16 %v71_v60, %v71_v60 }
  0x3a   :  { %1679 = vmatpush1.bf16.msra.mxu0 %v2752_v30  ;;  %v2792_v7 = vld [vmem:[#allocation3 + $0x324] ss:$16 sps:$4 sm:$0xff]   ;;  %v2795_v9 = vld [vmem:[#allocation3 + $0x320] ss:$16 sps:$4 sm:$0xff]  }
  0x3b   :  { %1720 = vmatpush1.bf16.msra.mxu1 %v2753_v31  ;;  %1680 = vmatprep.subr.bf16.mxu0 %v2754_v32  ;;  %v3223_v3 = vpack.c.bf16 %v73_v63, %v73_v63  ;;  %v2796_v10 = vld [vmem:[#allocation3 + $0x104] ss:$16 sps:$4 sm:$0xff]   ;;  %v2800_v12 = vld [vmem:[#allocation3 + $0x100] ss:$16 sps:$4 sm:$0xff]  }
  0x3c   :  { %1721 = vmatprep.subr.bf16.mxu1 %v2756_v33  ;;  %1696 = vmatprep.mubr.bf16.mxu0 %v3221_v62  ;;  %v2798_v11 = vld [vmem:[#allocation3 + $0x304] ss:$16 sps:$4 sm:$0xff]   ;;  %v2801_v13 = vld [vmem:[#allocation3 + $0x300] ss:$16 sps:$4 sm:$0xff]  }
  0x3d   :  { %1737 = vmatprep.mubr.bf16.mxu1 %v3223_v3  ;;  %v2805_v14 = vld [vmem:[#allocation3 + $0x4e4] ss:$16 sps:$4 sm:$0xff]   ;;  %v2803_v18 = vld [vmem:[#allocation3 + $0x4e0] ss:$16 sps:$4 sm:$0xff]  }
  0x3e   :  { %1681 = vmatpush2.bf16.msra.mxu0 %v2758_v34  ;;  %v2808_v15 = vld [vmem:[#allocation3 + $0x6e4] ss:$16 sps:$4 sm:$0xff]   ;;  %v2806_v19 = vld [vmem:[#allocation3 + $0x6e0] ss:$16 sps:$4 sm:$0xff]  }
  0x3f   :  { %1722 = vmatpush2.bf16.msra.mxu1 %v2759_v35  ;;  %1682 = vmatprep.subr.bf16.mxu0 %v2760_v39  ;;  %v2811_v20 = vld [vmem:[#allocation3 + $0x4c4] ss:$16 sps:$4 sm:$0xff]   ;;  %v2809_v22 = vld [vmem:[#allocation3 + $0x4c0] ss:$16 sps:$4 sm:$0xff]  }
  0x40   :  { %1723 = vmatprep.subr.bf16.mxu1 %v2762_v40  ;;  %v2814_v21 = vld [vmem:[#allocation3 + $0x6c4] ss:$16 sps:$4 sm:$0xff]   ;;  %v2812_v23 = vld [vmem:[#allocation3 + $0x6c0] ss:$16 sps:$4 sm:$0xff]  }
  0x41   :  { %v2817_v24 = vld [vmem:[#allocation3 + $0x4a4] ss:$16 sps:$4 sm:$0xff]   ;;  %v2815_v26 = vld [vmem:[#allocation3 + $0x4a0] ss:$16 sps:$4 sm:$0xff]  }
  0x42   :  { %1683 = vmatpush2.bf16.msra.mxu0 %v2764_v41  ;;  %v2820_v25 = vld [vmem:[#allocation3 + $0x6a4] ss:$16 sps:$4 sm:$0xff]   ;;  %v2818_v27 = vld [vmem:[#allocation3 + $0x6a0] ss:$16 sps:$4 sm:$0xff]  }
  0x43   :  { %1724 = vmatpush2.bf16.msra.mxu1 %v2765_v44  ;;  %1684 = vmatprep.subr.bf16.mxu0 %v2766_v45  ;;  %v2823_v28 = vld [vmem:[#allocation3 + $0x484] ss:$16 sps:$4 sm:$0xff]   ;;  %v2821_v30 = vld [vmem:[#allocation3 + $0x480] ss:$16 sps:$4 sm:$0xff]   ;;  %v3237_v44 = vrot.slane %v54_v42, %v3214_v49  ;;  %v74_v45 = vcombine.high %v54_v42, %v54_v42  ;;  %v2915_v42 = vld [vmem:[#allocation3 + $0x2a8] ss:$16 sps:$4 sm:$0xff]  }
  0x44   :  { %1725 = vmatprep.subr.bf16.mxu1 %v2768_v46  ;;  %v2826_v29 = vld [vmem:[#allocation3 + $0x684] ss:$16 sps:$4 sm:$0xff]   ;;  %v2824_v31 = vld [vmem:[#allocation3 + $0x680] ss:$16 sps:$4 sm:$0xff]  }
  0x45   :  { %v2829_v32 = vld [vmem:[#allocation3 + $0x464] ss:$16 sps:$4 sm:$0xff]   ;;  %v2827_v34 = vld [vmem:[#allocation3 + $0x460] ss:$16 sps:$4 sm:$0xff]  }
  0x46   :  { %1685 = vmatpush2.bf16.msra.mxu0 %v2770_v47  ;;  %v2832_v33 = vld [vmem:[#allocation3 + $0x664] ss:$16 sps:$4 sm:$0xff]   ;;  %v2830_v35 = vld [vmem:[#allocation3 + $0x660] ss:$16 sps:$4 sm:$0xff]  }
  0x47   :  { %1726 = vmatpush2.bf16.msra.mxu1 %v2771_v48  ;;  %1686 = vmatprep.subr.bf16.mxu0 %v2772_v50  ;;  %v2835_v36 = vld [vmem:[#allocation3 + $0x444] ss:$16 sps:$4 sm:$0xff]   ;;  %v2833_v38 = vld [vmem:[#allocation3 + $0x440] ss:$16 sps:$4 sm:$0xff]   ;;  %v89_v48 = vcombine.high %v3237_v44, %v3237_v44  ;;  %v3242_v50 = vrot.slane %v74_v45, %v3214_v49  ;;  %v2923_v45 = vld [vmem:[#allocation3 + $0x28c] ss:$16 sps:$4 sm:$0xff]  }
  0x48   :  { %1727 = vmatprep.subr.bf16.mxu1 %v2774_v51  ;;  %v2838_v37 = vld [vmem:[#allocation3 + $0x644] ss:$16 sps:$4 sm:$0xff]   ;;  %v2836_v39 = vld [vmem:[#allocation3 + $0x640] ss:$16 sps:$4 sm:$0xff]  }
  0x49   :  { %v2841_v40 = vld [vmem:[#allocation3 + $0x424] ss:$16 sps:$4 sm:$0xff]   ;;  %v2839_v46 = vld [vmem:[#allocation3 + $0x420] ss:$16 sps:$4 sm:$0xff]   ;;  %v90_v54 = vcombine.high %v3242_v50, %v3242_v50 }
  0x4a   :  { %1687 = vmatpush2.bf16.msra.mxu0 %v2776_v53  ;;  %v2844_v41 = vld [vmem:[#allocation3 + $0x624] ss:$16 sps:$4 sm:$0xff]   ;;  %v2842_v47 = vld [vmem:[#allocation3 + $0x620] ss:$16 sps:$4 sm:$0xff]   ;;  %v3244_v53 = vpack.c.bf16 %v89_v48, %v89_v48  ;;  %v2926_v48 = vld [vmem:[#allocation3 + $0x6c] ss:$16 sps:$4 sm:$0xff]  }
  0x4b   :  { %1728 = vmatpush2.bf16.msra.mxu1 %v2777_v56  ;;  %1688 = vmatprep.subr.bf16.mxu0 %v2778_v57  ;;  %v2847_v51 = vld [vmem:[#allocation3 + $0x404] ss:$16 sps:$4 sm:$0xff]   ;;  %v2845_v55 = vld [vmem:[#allocation3 + $0x400] ss:$16 sps:$4 sm:$0xff]   ;;  %v3248_v57 = vpack.c.bf16 %v90_v54, %v90_v54  ;;  %v2930_v54 = vld [vmem:[#allocation3 + $0x48] ss:$16 sps:$4 sm:$0xff]  }
  0x4c   :  { %1729 = vmatprep.subr.bf16.mxu1 %v2780_v58  ;;  %v2850_v52 = vld [vmem:[#allocation3 + $0x604] ss:$16 sps:$4 sm:$0xff]   ;;  %v2848_v56 = vld [vmem:[#allocation3 + $0x600] ss:$16 sps:$4 sm:$0xff]  }
  0x4d   :  { %v2853_v58 = vld [vmem:[#allocation3 + $0x5e4] ss:$16 sps:$4 sm:$0xff]   ;;  %v2851_v59 = vld [vmem:[#allocation3 + $0x5e0] ss:$16 sps:$4 sm:$0xff]  }
  0x4e   :  { %1689 = vmatpush2.bf16.msra.mxu0 %v2782_v61  ;;  %v2856_v49 = vld [vmem:[#allocation3 + $0x7e4] ss:$16 sps:$4 sm:$0xff]   ;;  %v2854_v60 = vld [vmem:[#allocation3 + $0x7e0] ss:$16 sps:$4 sm:$0xff]  }
  0x4f   :  { %1730 = vmatpush2.bf16.msra.mxu1 %v2783_v0  ;;  %1690 = vmatprep.subr.bf16.mxu0 %v2784_v1  ;;  %v2859_v61 = vld [vmem:[#allocation3 + $0x5c4] ss:$16 sps:$4 sm:$0xff]   ;;  %v2857_v0 = vld [vmem:[#allocation3 + $0x5c0] ss:$16 sps:$4 sm:$0xff]  }
  0x50   :  { %1731 = vmatprep.subr.bf16.mxu1 %v2786_v2  ;;  %v2862_v63 = vld [vmem:[#allocation3 + $0x7c4] ss:$16 sps:$4 sm:$0xff]   ;;  %v2860_v1 = vld [vmem:[#allocation3 + $0x7c0] ss:$16 sps:$4 sm:$0xff]  }
  0x51   :  { %v2865_v2 = vld [vmem:[#allocation3 + $0x5a4] ss:$16 sps:$4 sm:$0xff]  }
  0x52   :  { %1691 = vmatpush2.bf16.msra.mxu0 %v2788_v4  ;;  %v2868_v4 = vld [vmem:[#allocation3 + $0x7a4] ss:$16 sps:$4 sm:$0xff]  }
  0x53   :  { %1732 = vmatpush2.bf16.msra.mxu1 %v2789_v5  ;;  %1692 = vmatprep.subr.bf16.mxu0 %v2790_v6  ;;  %v2863_v5 = vld [vmem:[#allocation3 + $0x5a0] ss:$16 sps:$4 sm:$0xff]  }
  0x54   :  { %1733 = vmatprep.subr.bf16.mxu1 %v2792_v7  ;;  %v2866_v6 = vld [vmem:[#allocation3 + $0x7a0] ss:$16 sps:$4 sm:$0xff]   ;;  %v2871_v7 = vld [vmem:[#allocation3 + $0x584] ss:$16 sps:$4 sm:$0xff]  }
  0x56   :  { %1693 = vmatpush2.bf16.msra.mxu0 %v2794_v8  ;;  %v2874_v8 = vld [vmem:[#allocation3 + $0x784] ss:$16 sps:$4 sm:$0xff]  }
  0x57   :  { %1734 = vmatpush2.bf16.msra.mxu1 %v2795_v9  ;;  %1694 = vmatprep.subr.bf16.mxu0 %v2796_v10  ;;  %v2869_v9 = vld [vmem:[#allocation3 + $0x580] ss:$16 sps:$4 sm:$0xff]  }
  0x58   :  { %1735 = vmatprep.subr.bf16.mxu1 %v2798_v11  ;;  %v2872_v10 = vld [vmem:[#allocation3 + $0x780] ss:$16 sps:$4 sm:$0xff]   ;;  %v2877_v11 = vld [vmem:[#allocation3 + $0x564] ss:$16 sps:$4 sm:$0xff]  }
  0x5a   :  { %1695 = vmatpush2.bf16.msra.mxu0 %v2800_v12  ;;  %v2880_v12 = vld [vmem:[#allocation3 + $0x764] ss:$16 sps:$4 sm:$0xff]  }
  0x5b   :  { %1736 = vmatpush2.bf16.msra.mxu1 %v2801_v13  ;;  %1746 = vmatprep.subr.bf16.mxu0 %v2805_v14  ;;  %v2875_v13 = vld [vmem:[#allocation3 + $0x560] ss:$16 sps:$4 sm:$0xff]  }
  0x5c   :  { %1787 = vmatprep.subr.bf16.mxu1 %v2808_v15  ;;  %v2878_v14 = vld [vmem:[#allocation3 + $0x760] ss:$16 sps:$4 sm:$0xff]   ;;  %v2883_v15 = vld [vmem:[#allocation3 + $0x544] ss:$16 sps:$4 sm:$0xff]  }
  0x5d   :  { %1697 = vmatmul.mubr.bf16.vlgmr.msra.gmra.mxu0 %v3227_v16 }
  0x5e   :  { %1738 = vmatmul.mubr.bf16.vlgmr.msra.gmra.mxu1 %v3229_v17  ;;  %1747 = vmatpush1.bf16.msra.mxu0 %v2803_v18  ;;  %v2886_v18 = vld [vmem:[#allocation3 + $0x744] ss:$16 sps:$4 sm:$0xff]  }
  0x5f   :  { %1788 = vmatpush1.bf16.msra.mxu1 %v2806_v19  ;;  %1748 = vmatprep.subr.bf16.mxu0 %v2811_v20  ;;  %v2881_v19 = vld [vmem:[#allocation3 + $0x540] ss:$16 sps:$4 sm:$0xff]  }
  0x60   :  { %1789 = vmatprep.subr.bf16.mxu1 %v2814_v21  ;;  %1778 = vmatprep.mubr.bf16.mxu0 %v3244_v53  ;;  %v2884_v20 = vld [vmem:[#allocation3 + $0x740] ss:$16 sps:$4 sm:$0xff]   ;;  %v2889_v21 = vld [vmem:[#allocation3 + $0x524] ss:$16 sps:$4 sm:$0xff]  }
  0x61   :  { %1819 = vmatprep.mubr.bf16.mxu1 %v3248_v57 }
  0x62   :  { %1749 = vmatpush1.bf16.msra.mxu0 %v2809_v22  ;;  %v2892_v22 = vld [vmem:[#allocation3 + $0x724] ss:$16 sps:$4 sm:$0xff]  }
  0x63   :  { %1790 = vmatpush1.bf16.msra.mxu1 %v2812_v23  ;;  %1750 = vmatprep.subr.bf16.mxu0 %v2817_v24  ;;  %v2887_v23 = vld [vmem:[#allocation3 + $0x520] ss:$16 sps:$4 sm:$0xff]  }
  0x64   :  { %1791 = vmatprep.subr.bf16.mxu1 %v2820_v25  ;;  %v2890_v24 = vld [vmem:[#allocation3 + $0x720] ss:$16 sps:$4 sm:$0xff]   ;;  %v2895_v25 = vld [vmem:[#allocation3 + $0x504] ss:$16 sps:$4 sm:$0xff]  }
  0x66   :  { %1751 = vmatpush1.bf16.msra.mxu0 %v2815_v26  ;;  %v2898_v26 = vld [vmem:[#allocation3 + $0x704] ss:$16 sps:$4 sm:$0xff]  }
  0x67   :  { %1792 = vmatpush1.bf16.msra.mxu1 %v2818_v27  ;;  %1752 = vmatprep.subr.bf16.mxu0 %v2823_v28  ;;  %v2893_v27 = vld [vmem:[#allocation3 + $0x500] ss:$16 sps:$4 sm:$0xff]  }
  0x68   :  { %1793 = vmatprep.subr.bf16.mxu1 %v2826_v29  ;;  %v2896_v28 = vld [vmem:[#allocation3 + $0x700] ss:$16 sps:$4 sm:$0xff]   ;;  %v2902_v29 = vld [vmem:[#allocation3 + $0xec] ss:$16 sps:$4 sm:$0xff]  }
  0x6a   :  { %1753 = vmatpush1.bf16.msra.mxu0 %v2821_v30  ;;  %v2905_v30 = vld [vmem:[#allocation3 + $0x2ec] ss:$16 sps:$4 sm:$0xff]  }
  0x6b   :  { %1794 = vmatpush1.bf16.msra.mxu1 %v2824_v31  ;;  %1754 = vmatprep.subr.bf16.mxu0 %v2829_v32  ;;  %v3254_v31 = vpack.c.bf16 %v3237_v44, %v3237_v44  ;;  %v3258_v32 = vpack.c.bf16 %v3242_v50, %v3242_v50  ;;  %v2920_v44 = vld [vmem:[#allocation3 + $0x8c] ss:$16 sps:$4 sm:$0xff]  }
  0x6c   :  { %1795 = vmatprep.subr.bf16.mxu1 %v2832_v33  ;;  %v2900_v33 = vld [vmem:[#allocation3 + $0xe8] ss:$16 sps:$4 sm:$0xff]   ;;  %v2929_v50 = vld [vmem:[#allocation3 + $0x26c] ss:$16 sps:$4 sm:$0xff]  }
  0x6e   :  { %1755 = vmatpush1.bf16.msra.mxu0 %v2827_v34  ;;  %v2903_v34 = vld [vmem:[#allocation3 + $0x2e8] ss:$16 sps:$4 sm:$0xff]  }
  0x6f   :  { %1796 = vmatpush1.bf16.msra.mxu1 %v2830_v35  ;;  %1756 = vmatprep.subr.bf16.mxu0 %v2835_v36  ;;  %v2908_v35 = vld [vmem:[#allocation3 + $0xcc] ss:$16 sps:$4 sm:$0xff]  }
  0x70   :  { %1797 = vmatprep.subr.bf16.mxu1 %v2838_v37  ;;  %v2911_v36 = vld [vmem:[#allocation3 + $0x2cc] ss:$16 sps:$4 sm:$0xff]   ;;  %v2906_v37 = vld [vmem:[#allocation3 + $0xc8] ss:$16 sps:$4 sm:$0xff]  }
  0x72   :  { %1757 = vmatpush1.bf16.msra.mxu0 %v2833_v38  ;;  %v2909_v38 = vld [vmem:[#allocation3 + $0x2c8] ss:$16 sps:$4 sm:$0xff]  }
  0x73   :  { %1798 = vmatpush1.bf16.msra.mxu1 %v2836_v39  ;;  %1758 = vmatprep.subr.bf16.mxu0 %v2841_v40  ;;  %v2914_v39 = vld [vmem:[#allocation3 + $0xac] ss:$16 sps:$4 sm:$0xff]  }
  0x74   :  { %1799 = vmatprep.subr.bf16.mxu1 %v2844_v41  ;;  %v2917_v40 = vld [vmem:[#allocation3 + $0x2ac] ss:$16 sps:$4 sm:$0xff]   ;;  %v2912_v41 = vld [vmem:[#allocation3 + $0xa8] ss:$16 sps:$4 sm:$0xff]  }
  0x76   :  { %1759 = vmatpush1.bf16.msra.mxu0 %v2839_v46  ;;  %v2918_v46 = vld [vmem:[#allocation3 + $0x88] ss:$16 sps:$4 sm:$0xff]  }
  0x77   :  { %1800 = vmatpush1.bf16.msra.mxu1 %v2842_v47  ;;  %1760 = vmatprep.subr.bf16.mxu0 %v2847_v51  ;;  %v2921_v47 = vld [vmem:[#allocation3 + $0x288] ss:$16 sps:$4 sm:$0xff]   ;;  %v2932_v51 = vld [vmem:[#allocation3 + $0x4c] ss:$16 sps:$4 sm:$0xff]  }
  0x78   :  { %1801 = vmatprep.subr.bf16.mxu1 %v2850_v52  ;;  %v2935_v52 = vld [vmem:[#allocation3 + $0x24c] ss:$16 sps:$4 sm:$0xff]  }
  0x7a   :  { %1761 = vmatpush1.bf16.msra.mxu0 %v2845_v55  ;;  %v2933_v55 = vld [vmem:[#allocation3 + $0x248] ss:$16 sps:$4 sm:$0xff]  }
  0x7b   :  { %1802 = vmatpush1.bf16.msra.mxu1 %v2848_v56  ;;  %1762 = vmatprep.subr.bf16.mxu0 %v2853_v58  ;;  %v2938_v56 = vld [vmem:[#allocation3 + $0x2c] ss:$16 sps:$4 sm:$0xff]  }
  0x7c   :  { %1803 = vmatprep.subr.bf16.mxu1 %v2856_v49  ;;  %v2941_v58 = vld [vmem:[#allocation3 + $0x22c] ss:$16 sps:$4 sm:$0xff]   ;;  %v2936_v49 = vld [vmem:[#allocation3 + $0x28] ss:$16 sps:$4 sm:$0xff]  }
  0x7e   :  { %1763 = vmatpush2.bf16.msra.mxu0 %v2851_v59  ;;  %v2939_v59 = vld [vmem:[#allocation3 + $0x228] ss:$16 sps:$4 sm:$0xff]  }
  0x7f   :  { %1804 = vmatpush2.bf16.msra.mxu1 %v2854_v60  ;;  %1764 = vmatprep.subr.bf16.mxu0 %v2859_v61  ;;  %v2944_v60 = vld [vmem:[#allocation3 + $0xc] ss:$16 sps:$4 sm:$0xff]  }
  0x80   :  { %1805 = vmatprep.subr.bf16.mxu1 %v2862_v63  ;;  %v2947_v61 = vld [vmem:[#allocation3 + $0x20c] ss:$16 sps:$4 sm:$0xff]   ;;  %v2942_v63 = vld [vmem:[#allocation3 + $0x8] ss:$16 sps:$4 sm:$0xff]  }
  0x82   :  { %1765 = vmatpush2.bf16.msra.mxu0 %v2857_v0  ;;  %v2945_v0 = vld [vmem:[#allocation3 + $0x208] ss:$16 sps:$4 sm:$0xff]  }
  0x83   :  { %1806 = vmatpush2.bf16.msra.mxu1 %v2860_v1  ;;  %1766 = vmatprep.subr.bf16.mxu0 %v2865_v2  ;;  %v2950_v1 = vld [vmem:[#allocation3 + $0x1ec] ss:$16 sps:$4 sm:$0xff]  }
  0x84   :  { %1807 = vmatprep.subr.bf16.mxu1 %v2868_v4  ;;  %v2953_v2 = vld [vmem:[#allocation3 + $0x3ec] ss:$16 sps:$4 sm:$0xff]   ;;  %v2948_v4 = vld [vmem:[#allocation3 + $0x1e8] ss:$16 sps:$4 sm:$0xff]  }
  0x86   :  { %1767 = vmatpush2.bf16.msra.mxu0 %v2863_v5  ;;  %v2951_v5 = vld [vmem:[#allocation3 + $0x3e8] ss:$16 sps:$4 sm:$0xff]  }
  0x87   :  { %1808 = vmatpush2.bf16.msra.mxu1 %v2866_v6  ;;  %1768 = vmatprep.subr.bf16.mxu0 %v2871_v7  ;;  %v2956_v6 = vld [vmem:[#allocation3 + $0x1cc] ss:$16 sps:$4 sm:$0xff]  }
  0x88   :  { %1809 = vmatprep.subr.bf16.mxu1 %v2874_v8  ;;  %v2959_v7 = vld [vmem:[#allocation3 + $0x3cc] ss:$16 sps:$4 sm:$0xff]   ;;  %v2954_v8 = vld [vmem:[#allocation3 + $0x1c8] ss:$16 sps:$4 sm:$0xff]  }
  0x8a   :  { %1769 = vmatpush2.bf16.msra.mxu0 %v2869_v9  ;;  %v2957_v9 = vld [vmem:[#allocation3 + $0x3c8] ss:$16 sps:$4 sm:$0xff]  }
  0x8b   :  { %1810 = vmatpush2.bf16.msra.mxu1 %v2872_v10  ;;  %1770 = vmatprep.subr.bf16.mxu0 %v2877_v11  ;;  %v2962_v10 = vld [vmem:[#allocation3 + $0x1ac] ss:$16 sps:$4 sm:$0xff]  }
  0x8c   :  { %1811 = vmatprep.subr.bf16.mxu1 %v2880_v12  ;;  %v2965_v11 = vld [vmem:[#allocation3 + $0x3ac] ss:$16 sps:$4 sm:$0xff]   ;;  %v2960_v12 = vld [vmem:[#allocation3 + $0x1a8] ss:$16 sps:$4 sm:$0xff]  }
  0x8e   :  { %1771 = vmatpush2.bf16.msra.mxu0 %v2875_v13  ;;  %v2963_v13 = vld [vmem:[#allocation3 + $0x3a8] ss:$16 sps:$4 sm:$0xff]  }
  0x8f   :  { %1812 = vmatpush2.bf16.msra.mxu1 %v2878_v14  ;;  %1772 = vmatprep.subr.bf16.mxu0 %v2883_v15  ;;  %v2968_v14 = vld [vmem:[#allocation3 + $0x18c] ss:$16 sps:$4 sm:$0xff]  }
  0x90   :  { %1813 = vmatprep.subr.bf16.mxu1 %v2886_v18  ;;  %v2971_v15 = vld [vmem:[#allocation3 + $0x38c] ss:$16 sps:$4 sm:$0xff]   ;;  %v2966_v18 = vld [vmem:[#allocation3 + $0x188] ss:$16 sps:$4 sm:$0xff]  }
  0x92   :  { %1773 = vmatpush2.bf16.msra.mxu0 %v2881_v19  ;;  %v2969_v19 = vld [vmem:[#allocation3 + $0x388] ss:$16 sps:$4 sm:$0xff]  }
  0x93   :  { %1814 = vmatpush2.bf16.msra.mxu1 %v2884_v20  ;;  %1774 = vmatprep.subr.bf16.mxu0 %v2889_v21  ;;  %v2974_v20 = vld [vmem:[#allocation3 + $0x16c] ss:$16 sps:$4 sm:$0xff]  }
  0x94   :  { %1815 = vmatprep.subr.bf16.mxu1 %v2892_v22  ;;  %v2977_v21 = vld [vmem:[#allocation3 + $0x36c] ss:$16 sps:$4 sm:$0xff]   ;;  %v2972_v22 = vld [vmem:[#allocation3 + $0x168] ss:$16 sps:$4 sm:$0xff]  }
  0x96   :  { %1775 = vmatpush2.bf16.msra.mxu0 %v2887_v23  ;;  %v2975_v23 = vld [vmem:[#allocation3 + $0x368] ss:$16 sps:$4 sm:$0xff]  }
  0x97   :  { %1816 = vmatpush2.bf16.msra.mxu1 %v2890_v24  ;;  %1776 = vmatprep.subr.bf16.mxu0 %v2895_v25  ;;  %v2980_v24 = vld [vmem:[#allocation3 + $0x14c] ss:$16 sps:$4 sm:$0xff]  }
  0x98   :  { %1817 = vmatprep.subr.bf16.mxu1 %v2898_v26  ;;  %v2983_v25 = vld [vmem:[#allocation3 + $0x34c] ss:$16 sps:$4 sm:$0xff]   ;;  %v2978_v26 = vld [vmem:[#allocation3 + $0x148] ss:$16 sps:$4 sm:$0xff]  }
  0x9a   :  { %1777 = vmatpush2.bf16.msra.mxu0 %v2893_v27  ;;  %v2981_v27 = vld [vmem:[#allocation3 + $0x348] ss:$16 sps:$4 sm:$0xff]  }
  0x9b   :  { %1818 = vmatpush2.bf16.msra.mxu1 %v2896_v28  ;;  %1828 = vmatprep.subr.bf16.mxu0 %v2902_v29  ;;  %v2986_v28 = vld [vmem:[#allocation3 + $0x12c] ss:$16 sps:$4 sm:$0xff]  }
  0x9c   :  { %1869 = vmatprep.subr.bf16.mxu1 %v2905_v30  ;;  %v2989_v29 = vld [vmem:[#allocation3 + $0x32c] ss:$16 sps:$4 sm:$0xff]   ;;  %v2984_v30 = vld [vmem:[#allocation3 + $0x128] ss:$16 sps:$4 sm:$0xff]  }
  0x9d   :  { %1779 = vmatmul.mubr.bf16.vlgmr.msra.gmra.mxu0 %v3254_v31 }
  0x9e   :  { %1820 = vmatmul.mubr.bf16.vlgmr.msra.gmra.mxu1 %v3258_v32  ;;  %1829 = vmatpush1.bf16.msra.mxu0 %v2900_v33  ;;  %v2987_v33 = vld [vmem:[#allocation3 + $0x328] ss:$16 sps:$4 sm:$0xff]  }
  0x9f   :  { %1870 = vmatpush1.bf16.msra.mxu1 %v2903_v34  ;;  %1830 = vmatprep.subr.bf16.mxu0 %v2908_v35  ;;  %v2992_v34 = vld [vmem:[#allocation3 + $0x10c] ss:$16 sps:$4 sm:$0xff]  }
  0xa0   :  { %1871 = vmatprep.subr.bf16.mxu1 %v2911_v36  ;;  %1860 = vmatprep.mubr.bf16.mxu0 %v3221_v62  ;;  %v2924_v62 = vld [vmem:[#allocation3 + $0x68] ss:$16 sps:$4 sm:$0xff]   ;;  %v2995_v35 = vld [vmem:[#allocation3 + $0x30c] ss:$16 sps:$4 sm:$0xff]  }
  0xa1   :  { %1901 = vmatprep.mubr.bf16.mxu1 %v3223_v3  ;;  %v2927_v3 = vld [vmem:[#allocation3 + $0x268] ss:$16 sps:$4 sm:$0xff]  }
  0xa2   :  { %1831 = vmatpush1.bf16.msra.mxu0 %v2906_v37  ;;  %v2990_v36 = vld [vmem:[#allocation3 + $0x108] ss:$16 sps:$4 sm:$0xff]  }
  0xa3   :  { %1872 = vmatpush1.bf16.msra.mxu1 %v2909_v38  ;;  %1832 = vmatprep.subr.bf16.mxu0 %v2914_v39  ;;  %v2993_v37 = vld [vmem:[#allocation3 + $0x308] ss:$16 sps:$4 sm:$0xff]   ;;  %v2998_v38 = vld [vmem:[#allocation3 + $0x4ec] ss:$16 sps:$4 sm:$0xff]  }
  0xa4   :  { %1873 = vmatprep.subr.bf16.mxu1 %v2917_v40  ;;  %v3001_v39 = vld [vmem:[#allocation3 + $0x6ec] ss:$16 sps:$4 sm:$0xff]   ;;  %v2996_v40 = vld [vmem:[#allocation3 + $0x4e8] ss:$16 sps:$4 sm:$0xff]  }
  0xa6   :  { %1833 = vmatpush1.bf16.msra.mxu0 %v2912_v41  ;;  %v2999_v41 = vld [vmem:[#allocation3 + $0x6e8] ss:$16 sps:$4 sm:$0xff]  }
  0xa7   :  { %1874 = vmatpush1.bf16.msra.mxu1 %v2915_v42  ;;  %1834 = vmatprep.subr.bf16.mxu0 %v2920_v44  ;;  %v3004_v42 = vld [vmem:[#allocation3 + $0x4cc] ss:$16 sps:$4 sm:$0xff]  }
  0xa8   :  { %1875 = vmatprep.subr.bf16.mxu1 %v2923_v45  ;;  %v3007_v44 = vld [vmem:[#allocation3 + $0x6cc] ss:$16 sps:$4 sm:$0xff]   ;;  %v3002_v45 = vld [vmem:[#allocation3 + $0x4c8] ss:$16 sps:$4 sm:$0xff]  }
  0xaa   :  { %1835 = vmatpush1.bf16.msra.mxu0 %v2918_v46  ;;  %v3005_v46 = vld [vmem:[#allocation3 + $0x6c8] ss:$16 sps:$4 sm:$0xff]  }
  0xab   :  { %1876 = vmatpush1.bf16.msra.mxu1 %v2921_v47  ;;  %1836 = vmatprep.subr.bf16.mxu0 %v2926_v48  ;;  %v3010_v47 = vld [vmem:[#allocation3 + $0x4ac] ss:$16 sps:$4 sm:$0xff]  }
  0xac   :  { %1877 = vmatprep.subr.bf16.mxu1 %v2929_v50  ;;  %v3013_v48 = vld [vmem:[#allocation3 + $0x6ac] ss:$16 sps:$4 sm:$0xff]   ;;  %v3008_v50 = vld [vmem:[#allocation3 + $0x4a8] ss:$16 sps:$4 sm:$0xff]  }
  0xae   :  { %1837 = vmatpush1.bf16.msra.mxu0 %v2924_v62  ;;  %v3011_v62 = vld [vmem:[#allocation3 + $0x6a8] ss:$16 sps:$4 sm:$0xff]  }
  0xaf   :  { %1878 = vmatpush1.bf16.msra.mxu1 %v2927_v3  ;;  %1838 = vmatprep.subr.bf16.mxu0 %v2932_v51  ;;  %v3016_v3 = vld [vmem:[#allocation3 + $0x48c] ss:$16 sps:$4 sm:$0xff]   ;;  %v3017_v51 = vld [vmem:[#allocation3 + $0x688] ss:$16 sps:$4 sm:$0xff]  }
  0xb0   :  { %1879 = vmatprep.subr.bf16.mxu1 %v2935_v52  ;;  %v3022_v52 = vld [vmem:[#allocation3 + $0x46c] ss:$16 sps:$4 sm:$0xff]  }
  0xb2   :  { %1839 = vmatpush1.bf16.msra.mxu0 %v2930_v54  ;;  %v3025_v54 = vld [vmem:[#allocation3 + $0x66c] ss:$16 sps:$4 sm:$0xff]  }
  0xb3   :  { %1880 = vmatpush1.bf16.msra.mxu1 %v2933_v55  ;;  %1840 = vmatprep.subr.bf16.mxu0 %v2938_v56  ;;  %v3028_v55 = vld [vmem:[#allocation3 + $0x44c] ss:$16 sps:$4 sm:$0xff]  }
  0xb4   :  { %1881 = vmatprep.subr.bf16.mxu1 %v2941_v58  ;;  %v3031_v56 = vld [vmem:[#allocation3 + $0x64c] ss:$16 sps:$4 sm:$0xff]   ;;  %v3026_v58 = vld [vmem:[#allocation3 + $0x448] ss:$16 sps:$4 sm:$0xff]  }
  0xb6   :  { %1841 = vmatpush1.bf16.msra.mxu0 %v2936_v49  ;;  %v3029_v49 = vld [vmem:[#allocation3 + $0x648] ss:$16 sps:$4 sm:$0xff]  }
  0xb7   :  { %1882 = vmatpush1.bf16.msra.mxu1 %v2939_v59  ;;  %1842 = vmatprep.subr.bf16.mxu0 %v2944_v60  ;;  %v3034_v59 = vld [vmem:[#allocation3 + $0x42c] ss:$16 sps:$4 sm:$0xff]  }
  0xb8   :  { %1883 = vmatprep.subr.bf16.mxu1 %v2947_v61  ;;  %v3037_v60 = vld [vmem:[#allocation3 + $0x62c] ss:$16 sps:$4 sm:$0xff]   ;;  %v3032_v61 = vld [vmem:[#allocation3 + $0x428] ss:$16 sps:$4 sm:$0xff]  }
  0xba   :  { %1843 = vmatpush1.bf16.msra.mxu0 %v2942_v63  ;;  %v3035_v63 = vld [vmem:[#allocation3 + $0x628] ss:$16 sps:$4 sm:$0xff]  }
  0xbb   :  { %1884 = vmatpush1.bf16.msra.mxu1 %v2945_v0  ;;  %1844 = vmatprep.subr.bf16.mxu0 %v2950_v1  ;;  %v3040_v0 = vld [vmem:[#allocation3 + $0x40c] ss:$16 sps:$4 sm:$0xff]  }
  0xbc   :  { %1885 = vmatprep.subr.bf16.mxu1 %v2953_v2  ;;  %v3043_v1 = vld [vmem:[#allocation3 + $0x60c] ss:$16 sps:$4 sm:$0xff]   ;;  %v3038_v2 = vld [vmem:[#allocation3 + $0x408] ss:$16 sps:$4 sm:$0xff]  }
  0xbe   :  { %1845 = vmatpush2.bf16.msra.mxu0 %v2948_v4  ;;  %v3041_v4 = vld [vmem:[#allocation3 + $0x608] ss:$16 sps:$4 sm:$0xff]  }
  0xbf   :  { %1886 = vmatpush2.bf16.msra.mxu1 %v2951_v5  ;;  %1846 = vmatprep.subr.bf16.mxu0 %v2956_v6  ;;  %v3046_v5 = vld [vmem:[#allocation3 + $0x5ec] ss:$16 sps:$4 sm:$0xff]  }
  0xc0   :  { %1887 = vmatprep.subr.bf16.mxu1 %v2959_v7  ;;  %v3049_v6 = vld [vmem:[#allocation3 + $0x7ec] ss:$16 sps:$4 sm:$0xff]   ;;  %v3044_v7 = vld [vmem:[#allocation3 + $0x5e8] ss:$16 sps:$4 sm:$0xff]  }
  0xc2   :  { %1847 = vmatpush2.bf16.msra.mxu0 %v2954_v8  ;;  %v3047_v8 = vld [vmem:[#allocation3 + $0x7e8] ss:$16 sps:$4 sm:$0xff]  }
  0xc3   :  { %1888 = vmatpush2.bf16.msra.mxu1 %v2957_v9  ;;  %1848 = vmatprep.subr.bf16.mxu0 %v2962_v10  ;;  %v3052_v9 = vld [vmem:[#allocation3 + $0x5cc] ss:$16 sps:$4 sm:$0xff]  }
  0xc4   :  { %1889 = vmatprep.subr.bf16.mxu1 %v2965_v11  ;;  %v3055_v10 = vld [vmem:[#allocation3 + $0x7cc] ss:$16 sps:$4 sm:$0xff]   ;;  %v3050_v11 = vld [vmem:[#allocation3 + $0x5c8] ss:$16 sps:$4 sm:$0xff]  }
  0xc6   :  { %1849 = vmatpush2.bf16.msra.mxu0 %v2960_v12  ;;  %v3053_v12 = vld [vmem:[#allocation3 + $0x7c8] ss:$16 sps:$4 sm:$0xff]  }
  0xc7   :  { %1890 = vmatpush2.bf16.msra.mxu1 %v2963_v13  ;;  %1850 = vmatprep.subr.bf16.mxu0 %v2968_v14  ;;  %v3058_v13 = vld [vmem:[#allocation3 + $0x5ac] ss:$16 sps:$4 sm:$0xff]  }
  0xc8   :  { %1891 = vmatprep.subr.bf16.mxu1 %v2971_v15  ;;  %v3061_v14 = vld [vmem:[#allocation3 + $0x7ac] ss:$16 sps:$4 sm:$0xff]   ;;  %v3056_v15 = vld [vmem:[#allocation3 + $0x5a8] ss:$16 sps:$4 sm:$0xff]  }
  0xca   :  { %1851 = vmatpush2.bf16.msra.mxu0 %v2966_v18  ;;  %v3059_v18 = vld [vmem:[#allocation3 + $0x7a8] ss:$16 sps:$4 sm:$0xff]  }
  0xcb   :  { %1892 = vmatpush2.bf16.msra.mxu1 %v2969_v19  ;;  %1852 = vmatprep.subr.bf16.mxu0 %v2974_v20  ;;  %v3064_v19 = vld [vmem:[#allocation3 + $0x58c] ss:$16 sps:$4 sm:$0xff]  }
  0xcc   :  { %1893 = vmatprep.subr.bf16.mxu1 %v2977_v21  ;;  %v3067_v20 = vld [vmem:[#allocation3 + $0x78c] ss:$16 sps:$4 sm:$0xff]   ;;  %v3062_v21 = vld [vmem:[#allocation3 + $0x588] ss:$16 sps:$4 sm:$0xff]  }
  0xce   :  { %1853 = vmatpush2.bf16.msra.mxu0 %v2972_v22  ;;  %v3065_v22 = vld [vmem:[#allocation3 + $0x788] ss:$16 sps:$4 sm:$0xff]  }
  0xcf   :  { %1894 = vmatpush2.bf16.msra.mxu1 %v2975_v23  ;;  %1854 = vmatprep.subr.bf16.mxu0 %v2980_v24  ;;  %v3070_v23 = vld [vmem:[#allocation3 + $0x56c] ss:$16 sps:$4 sm:$0xff]  }
  0xd0   :  { %1895 = vmatprep.subr.bf16.mxu1 %v2983_v25  ;;  %v3073_v24 = vld [vmem:[#allocation3 + $0x76c] ss:$16 sps:$4 sm:$0xff]   ;;  %v3068_v25 = vld [vmem:[#allocation3 + $0x568] ss:$16 sps:$4 sm:$0xff]  }
  0xd2   :  { %1855 = vmatpush2.bf16.msra.mxu0 %v2978_v26  ;;  %v3071_v26 = vld [vmem:[#allocation3 + $0x768] ss:$16 sps:$4 sm:$0xff]  }
  0xd3   :  { %1896 = vmatpush2.bf16.msra.mxu1 %v2981_v27  ;;  %1856 = vmatprep.subr.bf16.mxu0 %v2986_v28  ;;  %v3076_v27 = vld [vmem:[#allocation3 + $0x54c] ss:$16 sps:$4 sm:$0xff]  }
  0xd4   :  { %1897 = vmatprep.subr.bf16.mxu1 %v2989_v29  ;;  %v3079_v28 = vld [vmem:[#allocation3 + $0x74c] ss:$16 sps:$4 sm:$0xff]   ;;  %v3074_v29 = vld [vmem:[#allocation3 + $0x548] ss:$16 sps:$4 sm:$0xff]  }
  0xd6   :  { %1857 = vmatpush2.bf16.msra.mxu0 %v2984_v30  ;;  %v3077_v30 = vld [vmem:[#allocation3 + $0x748] ss:$16 sps:$4 sm:$0xff]  }
  0xd7   :  { %1898 = vmatpush2.bf16.msra.mxu1 %v2987_v33  ;;  %1858 = vmatprep.subr.bf16.mxu0 %v2992_v34  ;;  %v3082_v33 = vld [vmem:[#allocation3 + $0x52c] ss:$16 sps:$4 sm:$0xff]  }
  0xd8   :  { %1899 = vmatprep.subr.bf16.mxu1 %v2995_v35  ;;  %v3085_v34 = vld [vmem:[#allocation3 + $0x72c] ss:$16 sps:$4 sm:$0xff]   ;;  %v3080_v35 = vld [vmem:[#allocation3 + $0x528] ss:$16 sps:$4 sm:$0xff]  }
  0xda   :  { %1859 = vmatpush2.bf16.msra.mxu0 %v2990_v36  ;;  %v3083_v36 = vld [vmem:[#allocation3 + $0x728] ss:$16 sps:$4 sm:$0xff]  }
  0xdb   :  { %1900 = vmatpush2.bf16.msra.mxu1 %v2993_v37  ;;  %1910 = vmatprep.subr.bf16.mxu0 %v2998_v38  ;;  %v3088_v37 = vld [vmem:[#allocation3 + $0x50c] ss:$16 sps:$4 sm:$0xff]  }
  0xdc   :  { %1951 = vmatprep.subr.bf16.mxu1 %v3001_v39  ;;  %v3091_v38 = vld [vmem:[#allocation3 + $0x70c] ss:$16 sps:$4 sm:$0xff]   ;;  %v3086_v39 = vld [vmem:[#allocation3 + $0x508] ss:$16 sps:$4 sm:$0xff]  }
  0xdd   :  { %1861 = vmatmul.mubr.bf16.vlgmr.msra.gmra.mxu0 %v3227_v16  ;;  %v3019_v16 = vld [vmem:[#allocation3 + $0x68c] ss:$16 sps:$4 sm:$0xff]  }
  0xde   :  { %1902 = vmatmul.mubr.bf16.vlgmr.msra.gmra.mxu1 %v3229_v17  ;;  %1911 = vmatpush1.bf16.msra.mxu0 %v2996_v40  ;;  %v3014_v17 = vld [vmem:[#allocation3 + $0x488] ss:$16 sps:$4 sm:$0xff]  }
  0xdf   :  { %1952 = vmatpush1.bf16.msra.mxu1 %v2999_v41  ;;  %1912 = vmatprep.subr.bf16.mxu0 %v3004_v42  ;;  %v3089_v40 = vld [vmem:[#allocation3 + $0x708] ss:$16 sps:$4 sm:$0xff]  }
  0xe0   :  { %1953 = vmatprep.subr.bf16.mxu1 %v3007_v44  ;;  %1942 = vmatprep.mubr.bf16.mxu0 %v3244_v53  ;;  %v3020_v53 = vld [vmem:[#allocation3 + $0x468] ss:$16 sps:$4 sm:$0xff]   ;;  %v3094_v44 = vld [vmem:[#allocation5 + $0x70] sm:$0xff]  }
  0xe1   :  { %1983 = vmatprep.mubr.bf16.mxu1 %v3248_v57  ;;  %v3023_v57 = vld [vmem:[#allocation3 + $0x668] ss:$16 sps:$4 sm:$0xff]  }
  0xe2   :  { %1913 = vmatpush1.bf16.msra.mxu0 %v3002_v45  ;;  %v3092_v41 = vld [vmem:[#allocation5 + $0x78] sm:$0xff]  }
  0xe3   :  { %1954 = vmatpush1.bf16.msra.mxu1 %v3005_v46  ;;  %1914 = vmatprep.subr.bf16.mxu0 %v3010_v47  ;;  %v3093_v42 = vld [vmem:[#allocation5 + $0x38] sm:$0xff]   ;;  %v3095_v47 = vld [vmem:[#allocation5 + $0x30] sm:$0xff]  }
  0xe4   :  { %1955 = vmatprep.subr.bf16.mxu1 %v3013_v48 }
  0xe6   :  { %1915 = vmatpush1.bf16.msra.mxu0 %v3008_v50 }
  0xe7   :  { %1956 = vmatpush1.bf16.msra.mxu1 %v3011_v62  ;;  %1916 = vmatprep.subr.bf16.mxu0 %v3016_v3  ;;  %v3096_v62 = vld [vmem:[#allocation5 + $0x68] sm:$0xff]  }
  0xe8   :  { %1957 = vmatprep.subr.bf16.mxu1 %v3019_v16 }
  0xea   :  { %1917 = vmatpush1.bf16.msra.mxu0 %v3014_v17  ;;  %v3097_v17 = vld [vmem:[#allocation5 + $0x28] sm:$0xff]  }
  0xeb   :  { %1958 = vmatpush1.bf16.msra.mxu1 %v3017_v51  ;;  %1918 = vmatprep.subr.bf16.mxu0 %v3022_v52  ;;  %v3098_v51 = vld [vmem:[#allocation5 + $0x60] sm:$0xff]  }
  0xec   :  { %1959 = vmatprep.subr.bf16.mxu1 %v3025_v54 }
  0xee   :  { %1919 = vmatpush1.bf16.msra.mxu0 %v3020_v53  ;;  %v3108_v53 = vld [vmem:[#allocation5 + $0xf8] sm:$0xff]  }
  0xef   :  { %1960 = vmatpush1.bf16.msra.mxu1 %v3023_v57  ;;  %1920 = vmatprep.subr.bf16.mxu0 %v3028_v55  ;;  %v3109_v57 = vld [vmem:[#allocation5 + $0xb8] sm:$0xff]   ;;  %v3111_v55 = vld [vmem:[#allocation5 + $0xb0] sm:$0xff]  }
  0xf0   :  { %1961 = vmatprep.subr.bf16.mxu1 %v3031_v56  ;;  %v3100_v56 = vld [vmem:[#allocation5 + $0x58] sm:$0xff]  }
  0xf2   :  { %1921 = vmatpush1.bf16.msra.mxu0 %v3026_v58  ;;  %v3112_v58 = vld [vmem:[#allocation5 + $0xe8] sm:$0xff]  }
  0xf3   :  { %1962 = vmatpush1.bf16.msra.mxu1 %v3029_v49  ;;  %1922 = vmatprep.subr.bf16.mxu0 %v3034_v59  ;;  %v3101_v49 = vld [vmem:[#allocation5 + $0x18] sm:$0xff]   ;;  %v3113_v59 = vld [vmem:[#allocation5 + $0xa8] sm:$0xff]  }
  0xf4   :  { %1963 = vmatprep.subr.bf16.mxu1 %v3037_v60  ;;  %v3102_v60 = vld [vmem:[#allocation5 + $0x50] sm:$0xff]  }
  0xf6   :  { %1923 = vmatpush1.bf16.msra.mxu0 %v3032_v61  ;;  %v3114_v61 = vld [vmem:[#allocation5 + $0xe0] sm:$0xff]  }
  0xf7   :  { %1964 = vmatpush1.bf16.msra.mxu1 %v3035_v63  ;;  %1924 = vmatprep.subr.bf16.mxu0 %v3040_v0  ;;  %v3103_v63 = vld [vmem:[#allocation5 + $0x10] sm:$0xff]   ;;  %v3115_v0 = vld [vmem:[#allocation5 + $0xa0] sm:$0xff]  }
  0xf8   :  { %1965 = vmatprep.subr.bf16.mxu1 %v3043_v1  ;;  %v3104_v1 = vld [vmem:[#allocation5 + $0x48] sm:$0xff]  }
  0xfa   :  { %1925 = vmatpush1.bf16.msra.mxu0 %v3038_v2  ;;  %v3116_v2 = vld [vmem:[#allocation5 + $0xd8] sm:$0xff]  }
  0xfb   :  { %1966 = vmatpush1.bf16.msra.mxu1 %v3041_v4  ;;  %1926 = vmatprep.subr.bf16.mxu0 %v3046_v5  ;;  %v3105_v4 = vld [vmem:[#allocation5 + $0x8] sm:$0xff]   ;;  %v3117_v5 = vld [vmem:[#allocation5 + $0x98] sm:$0xff]  }
  0xfc   :  { %1967 = vmatprep.subr.bf16.mxu1 %v3049_v6  ;;  %v3106_v6 = vld [vmem:[#allocation5 + $0x40] sm:$0xff]  }
  0xfe   :  { %1927 = vmatpush2.bf16.msra.mxu0 %v3044_v7  ;;  %v3107_v7 = vld [vmem:[#allocation5] sm:$0xff]  }
  0xff   :  { %1968 = vmatpush2.bf16.msra.mxu1 %v3047_v8  ;;  %1928 = vmatprep.subr.bf16.mxu0 %v3052_v9  ;;  %v366_v8 = vsub.s32 0, %v3211_v43  ;;  %v50_v9 = vld [vmem:[%s3301_s3] sm:$0xf] }
 0x100   :  { %1969 = vmatprep.subr.bf16.mxu1 %v3055_v10  ;;  %v370_v10 = vsub.s32 1, %v3211_v43 }
 0x102   :  { %1929 = vmatpush2.bf16.msra.mxu0 %v3050_v11  ;;  %v367_v11 = vrot.slane %v50_v9, %v366_v8 }
 0x103   :  { %1970 = vmatpush2.bf16.msra.mxu1 %v3053_v12  ;;  %1930 = vmatprep.subr.bf16.mxu0 %v3058_v13  ;;  %v371_v12 = vrot.slane %v50_v9, %v370_v10 }
 0x104   :  { %1971 = vmatprep.subr.bf16.mxu1 %v3061_v14 }
 0x106   :  { %1931 = vmatpush2.bf16.msra.mxu0 %v3056_v15  ;;  %v3118_v15 = vld [vmem:[#allocation5 + $0xd0] sm:$0xff]  }
 0x107   :  { %1972 = vmatpush2.bf16.msra.mxu1 %v3059_v18  ;;  %1932 = vmatprep.subr.bf16.mxu0 %v3064_v19  ;;  %v3119_v19 = vld [vmem:[#allocation5 + $0x90] sm:$0xff]  }
 0x108   :  { %1973 = vmatprep.subr.bf16.mxu1 %v3067_v20 }
 0x10a   :  { %1933 = vmatpush2.bf16.msra.mxu0 %v3062_v21 }
 0x10b   :  { %1974 = vmatpush2.bf16.msra.mxu1 %v3065_v22  ;;  %1934 = vmatprep.subr.bf16.mxu0 %v3070_v23 }
 0x10c   :  { %1975 = vmatprep.subr.bf16.mxu1 %v3073_v24 }
 0x10e   :  { %1935 = vmatpush2.bf16.msra.mxu0 %v3068_v25 }
 0x10f   :  { %1976 = vmatpush2.bf16.msra.mxu1 %v3071_v26  ;;  %1936 = vmatprep.subr.bf16.mxu0 %v3076_v27  ;;  %v3120_v26 = vld [vmem:[#allocation5 + $0xc8] sm:$0xff]  }
 0x110   :  { %1977 = vmatprep.subr.bf16.mxu1 %v3079_v28 }
 0x112   :  { %1937 = vmatpush2.bf16.msra.mxu0 %v3074_v29  ;;  %v3121_v29 = vld [vmem:[#allocation5 + $0x88] sm:$0xff]  }
 0x113   :  { %1978 = vmatpush2.bf16.msra.mxu1 %v3077_v30  ;;  %1938 = vmatprep.subr.bf16.mxu0 %v3082_v33 }
 0x114   :  { %1979 = vmatprep.subr.bf16.mxu1 %v3085_v34 }
 0x116   :  { %1939 = vmatpush2.bf16.msra.mxu0 %v3080_v35 }
 0x117   :  { %1980 = vmatpush2.bf16.msra.mxu1 %v3083_v36  ;;  %1940 = vmatprep.subr.bf16.mxu0 %v3088_v37 }
 0x118   :  { %1981 = vmatprep.subr.bf16.mxu1 %v3091_v38  ;;  %v3122_v38 = vld [vmem:[#allocation5 + $0xc0] sm:$0xff]  }
 0x11a   :  { %1941 = vmatpush2.bf16.msra.mxu0 %v3086_v39 }
 0x11b   :  { %1982 = vmatpush2.bf16.msra.mxu1 %v3089_v40  ;;  %2655 = vmatprep.subr.bf16.mxu0 %v3092_v41  ;;  %v3123_v40 = vld [vmem:[#allocation5 + $0x80] sm:$0xff]  }
 0x11c   :  { %2677 = vmatprep.subr.bf16.mxu1 %v3108_v53 }
 0x11d   :  { %v3268_v45 = vpop.f32.mrf.mxu0  ;;  %1943 = vmatmul.mubr.bf16.vlgmr.msra.gmra.mxu0 %v3254_v31  ;;  %v3110_v31 = vld [vmem:[#allocation5 + $0xf0] sm:$0xff]  }
 0x11e   :  { %v3270_v46 = vpop.f32.mrf.mxu1  ;;  %1984 = vmatmul.mubr.bf16.vlgmr.msra.gmra.mxu1 %v3258_v32  ;;  %2656 = vmatpush3.bf16.msra.mxu0 %v3093_v42  ;;  %v3099_v32 = vld [vmem:[#allocation5 + $0x20] sm:$0xff]   ;;  %v1699_v13 = vadd.f32 %v3268_v45, %v367_v11 }
 0x11f   :  { %v1700_v48 = vpop.f32.mrf.mxu0  ;;  %2657 = vmatprep.subr.bf16.mxu0 %v3094_v44  ;;  %2678 = vmatpush3.bf16.msra.mxu1 %v3109_v57 }
 0x120   :  { %v3274_v50 = vpop.f32.mrf.mxu1  ;;  %2679 = vmatprep.subr.bf16.mxu1 %v3110_v31  ;;  %v1701_v14 = vadd.f32 %v1700_v48, %v371_v12  ;;  %v1740_v18 = vadd.f32 %v3270_v46, %v1699_v13  ;;  %v2621_v12 = vld [vmem:[%s3301_s3 + $0x4] ss:$0 sm:$0xff] }
 0x121   :  { %v1702_v3 = vpop.f32.mrf.mxu0 }
 0x122   :  { %v1743_v16 = vpop.f32.mrf.mxu1  ;;  %2658 = vmatpush3.bf16.msra.mxu0 %v3095_v47  ;;  %v1742_v22 = vadd.f32 %v3274_v50, %v1701_v14 }
 0x123   :  { %v1703_v52 = vpop.f32.mrf.mxu0  ;;  %2659 = vmatprep.subr.bf16.mxu0 %v3096_v62  ;;  %2680 = vmatpush3.bf16.msra.mxu1 %v3111_v55  ;;  %v374_v16 = vsub.s32 2, %v3211_v43 }
 0x124   :  { %v1744_v54 = vpop.f32.mrf.mxu1  ;;  %2681 = vmatprep.subr.bf16.mxu1 %v3112_v58 }
 0x126   :  { %2660 = vmatpush3.bf16.msra.mxu0 %v3097_v17  ;;  %v378_v17 = vsub.s32 3, %v3211_v43 }
 0x127   :  { %2661 = vmatprep.subr.bf16.mxu0 %v3098_v51  ;;  %2682 = vmatpush3.bf16.msra.mxu1 %v3113_v59  ;;  %v375_v51 = vrot.slane %v50_v9, %v374_v16 }
 0x128   :  { %2683 = vmatprep.subr.bf16.mxu1 %v3114_v61  ;;  %v379_v52 = vrot.slane %v50_v9, %v378_v17 }
 0x12a   :  { %2662 = vmatpush3.bf16.msra.mxu0 %v3099_v32 }
 0x12b   :  { %2663 = vmatprep.subr.bf16.mxu0 %v3100_v56  ;;  %2684 = vmatpush3.bf16.msra.mxu1 %v3115_v0 }
 0x12c   :  { %2685 = vmatprep.subr.bf16.mxu1 %v3116_v2 }
 0x12e   :  { %2664 = vmatpush3.bf16.msra.mxu0 %v3101_v49 }
 0x12f   :  { %2665 = vmatprep.subr.bf16.mxu0 %v3102_v60  ;;  %2686 = vmatpush3.bf16.msra.mxu1 %v3117_v5 }
 0x130   :  { %2687 = vmatprep.subr.bf16.mxu1 %v3118_v15 }
 0x132   :  { %2666 = vmatpush3.bf16.msra.mxu0 %v3103_v63 }
 0x133   :  { %2667 = vmatprep.subr.bf16.mxu0 %v3104_v1  ;;  %2688 = vmatpush3.bf16.msra.mxu1 %v3119_v19 }
 0x134   :  { %2689 = vmatprep.subr.bf16.mxu1 %v3120_v26  ;;  %v2355_v26 = vstv %s3302_s4 }
 0x136   :  { %2668 = vmatpush3.bf16.msra.mxu0 %v3105_v4 }
 0x137   :  { %2669 = vmatprep.subr.bf16.mxu0 %v3106_v6  ;;  %2690 = vmatpush3.bf16.msra.mxu1 %v3121_v29 }
 0x138   :  { %2691 = vmatprep.subr.bf16.mxu1 %v3122_v38 }
 0x13a   :  { %2670 = vmatpush3.bf16.msra.mxu0 %v3107_v7 }
 0x13b   :  { %2692 = vmatpush3.bf16.msra.mxu1 %v3123_v40 }
 0x15d   :  { %v1780_v20 = vpop.f32.mrf.mxu0 }
 0x15e   :  { %v1821_v21 = vpop.f32.mrf.mxu1  ;;  %v1781_v23 = vadd.f32 %v1780_v20, %v1740_v18 }
 0x15f   :  { %v1782_v24 = vpop.f32.mrf.mxu0 }
 0x160   :  { %v1823_v25 = vpop.f32.mrf.mxu1  ;;  %v1822_v27 = vadd.f32 %v1821_v21, %v1781_v23  ;;  %v1783_v28 = vadd.f32 %v1782_v24, %v1742_v22  ;;  %v2654_v22 = vld [vmem:[%s3301_s3 + $0x5] ss:$0 sm:$0xff] }
 0x161   :  { %v1784_v30 = vpop.f32.mrf.mxu0 }
 0x162   :  { %v1825_v33 = vpop.f32.mrf.mxu1  ;;  %v1824_v34 = vadd.f32 %v1823_v25, %v1783_v28  ;;  %v1992_v35 = vmax.f32 %v1822_v27, 0.0 }
 0x163   :  { %v1785_v36 = vpop.f32.mrf.mxu0 }
 0x164   :  { %v1826_v37 = vpop.f32.mrf.mxu1  ;;  %v1993_v39 = vmax.f32 %v1824_v34, 0.0  ;;  %v1996_v42 = vpack.c.bf16 %v1992_v35, %v1992_v35 }
 0x166   :  { %v1997_v41 = vpack.c.bf16 %v1993_v39, %v1993_v39 }
 0x168   :  { %2294 = vmatprep.mubr.bf16.mxu0 %v1997_v41 }
 0x169   :  { %2295 = vmatmul.mubr.bf16.vlgmr.msra.gmra.mxu0 %v1996_v42 }
 0x19d   :  { %v1862_v44 = vpop.f32.mrf.mxu0 }
 0x19e   :  { %v1903_v45 = vpop.f32.mrf.mxu1  ;;  %v1863_v54 = vadd.f32 %v1862_v44, %v375_v51 }
 0x19f   :  { %v1864_v46 = vpop.f32.mrf.mxu0 }
 0x1a0   :  { %v1905_v47 = vpop.f32.mrf.mxu1  ;;  %v1865_v53 = vadd.f32 %v1864_v46, %v379_v52  ;;  %v1904_v57 = vadd.f32 %v1903_v45, %v1863_v54 }
 0x1a1   :  { %v1866_v48 = vpop.f32.mrf.mxu0 }
 0x1a2   :  { %v1907_v50 = vpop.f32.mrf.mxu1  ;;  %v1906_v55 = vadd.f32 %v1905_v47, %v1865_v53 }
 0x1a3   :  { %v1867_v62 = vpop.f32.mrf.mxu0 }
 0x1a4   :  { %v1908_v3 = vpop.f32.mrf.mxu1 }
 0x1dd   :  { %v1944_v31 = vpop.f32.mrf.mxu0 }
 0x1de   :  { %v1985_v32 = vpop.f32.mrf.mxu1  ;;  %v1945_v56 = vadd.f32 %v1944_v31, %v1904_v57 }
 0x1df   :  { %v1946_v58 = vpop.f32.mrf.mxu0 }
 0x1e0   :  { %v1987_v49 = vpop.f32.mrf.mxu1  ;;  %v1986_v59 = vadd.f32 %v1985_v32, %v1945_v56  ;;  %v1947_v60 = vadd.f32 %v1946_v58, %v1906_v55 }
 0x1e1   :  { %v1948_v61 = vpop.f32.mrf.mxu0 }
 0x1e2   :  { %v1989_v63 = vpop.f32.mrf.mxu1  ;;  %v1988_v0 = vadd.f32 %v1987_v49, %v1947_v60  ;;  %v1994_v1 = vmax.f32 %v1986_v59, 0.0 }
 0x1e3   :  { %v1949_v2 = vpop.f32.mrf.mxu0 }
 0x1e4   :  { %v1990_v4 = vpop.f32.mrf.mxu1  ;;  %v1995_v43 = vmax.f32 %v1988_v0, 0.0  ;;  %v1998_v6 = vpack.c.bf16 %v1994_v1, %v1994_v1 }
 0x1e6   :  { %v1999_v5 = vpack.c.bf16 %v1995_v43, %v1995_v43 }
 0x1e8   :  { %2334 = vmatprep.mubr.bf16.mxu1 %v1999_v5 }
 0x1e9   :  { %2335 = vmatmul.mubr.bf16.vlgmr.msra.gmra.mxu1 %v1998_v6 }
 0x229   :  { %v2671_v7 = vpop.f32.mrf.mxu0 }
 0x22b   :  { %v2672_v8 = vpop.f32.mrf.mxu0 }
 0x22c   :  { %v2673_v9 = vadd.f32 %v2672_v8, %v2671_v7 }
 0x22d   :  { %v2674_v10 = vpop.f32.mrf.mxu0 }
 0x22e   :  { %v2297_v15 = vadd.f32 %v2673_v9, %v2621_v12 }
 0x22f   :  { %v2675_v11 = vpop.f32.mrf.mxu0 }
 0x2a9   :  { %v2693_v13 = vpop.f32.mrf.mxu1 }
 0x2ab   :  { %v2694_v14 = vpop.f32.mrf.mxu1 }
 0x2ac   :  { %v2695_v18 = vadd.f32 %v2694_v14, %v2693_v13 }
 0x2ad   :  { %v2696_v19 = vpop.f32.mrf.mxu1 }
 0x2ae   :  { %v2337_v20 = vadd.f32 %v2695_v18, %v2297_v15 }
 0x2af   :  { %v2697_v21 = vpop.f32.mrf.mxu1 }
 0x2b0   :  { %v2342_v23 = vmax.f32 %v2337_v20, 0.0 }
 0x2b2   :  { %v2349_v24 = vmul.f32 %v2654_v22, %v2342_v23 }
 0x2b4   :  { %v2351_v25 = vsel %vm2350_vm0, %v2349_v24, 0.0 }
 0x2b5   :  { %2352 = vadd.xlane.f32.xlu0 %v2351_v25 }
 0x33e   :  { %v2353_v27 = vpop.xlane.xlu0 %2352 }
 0x33f   :  { %v2356_v28 = vadd.f32 %v2355_v26, %v2353_v27 }
 0x341   :  { %2358 = vst.msk [vmem:[%s3303_s5] sm:$0x3] %vm2357_vm1, %v2356_v28 }
 0x342   :  { %2363 = vsyncpa [#allocation4], 1 }
 0x343   :  { %2364 = vsyncpa [#allocation6], 1 }

</bundles_post_ra>
